<compile_context>
chip_gen: v7x
topology: tpu7x:2x2x1
jax: 0.10.0
libtpu: 0.0.40
codegen_flags: <defaults>
</compile_context>

<pallas_src>
import jax
import jax.numpy as jnp
import numpy as np
from jax import lax
from jax.experimental import pallas as pl
from jax.experimental.pallas import tpu as pltpu


_VMEM_BUDGET_BYTES = 40 * 1024 * 1024   # target working set (fits v7x 64 MiB with headroom)
_VMEM_LIMIT_BYTES = 48 * 1024 * 1024    # raised scoped-VMEM limit (safe on v5e/v6e/v7x)


def _pick_block_t(T, S, D, block_b, in_isz, out_isz, align_isz, w_isz,
                  budget=_VMEM_BUDGET_BYTES):
    """Largest query tile (multiple of 8) whose double-buffered working set fits `budget`."""
    if T <= 8:
        return T

    def vmem_estimate(tq):
        ins = 2 * block_b * (tq * D + S * D) * in_isz            # source + memory tiles (x2 buffers)
        outs = 2 * tq * block_b * (D * out_isz + S * align_isz)  # attn_h + align tiles (x2 buffers)
        weights = 2 * 2 * D * D * w_isz                          # Wc + Ws (x2 buffers)
        return ins + outs + weights

    tq = min(T, 512)
    tq = max(8, tq - tq % 8)
    while tq > 8 and vmem_estimate(tq) > budget:
        tq = max(8, (tq // 2) - (tq // 2) % 8)
    return tq


def _make_kernel(block_b, block_t, S, D, compute_dtype, approx_recip):
    # Fuse the output-projection rows (M = Bb*Tq) only when the (Bb, Tq, D) -> (Bb*Tq, D)
    # collapse is sublane-aligned for the compute dtype (f32: 8 rows, bf16: 16 rows).
    packing = max(1, 4 // np.dtype(compute_dtype).itemsize)
    fuse_rows = (block_t % (8 * packing) == 0)

    def kernel(len_ref, src_ref, mem_ref, wc_ref, ws_ref, out_ref, attn_ref):
        bb = pl.program_id(1)
        q_all = src_ref[...].astype(compute_dtype)          # (Bb, Tq, D)
        wc = wc_ref[...]                                    # (D, D), compute_dtype
        ws = ws_ref[...]                                    # (D, D), compute_dtype

        a_list, c_list, h_list = [], [], []
        for b in range(block_b):                            # static unroll (Bb <= 8 typical)
            q = q_all[b]                                    # (Tq, D)
            m = mem_ref[b].astype(compute_dtype)            # (S, D)

            # scores[t, s] = <q[t], m[s]>; contracting dims (1, 1) feed the MXU the
            # transposed RHS directly (no XLU transpose of the (S, D) tile).
            scores = lax.dot_general(q, m, (((1,), (1,)), ((), ())),
                                     preferred_element_type=jnp.float32)

            # sequence-length mask: src positions >= length -> -inf (matches masked_fill)
            length = len_ref[bb * block_b + b]
            col = lax.broadcasted_iota(jnp.int32, scores.shape, 1)
            scores = jnp.where(col < length, scores, -jnp.inf)

            # softmax over src_len; reciprocal on the EUP slot when approx_recip=True
            mx = jnp.max(scores, axis=-1, keepdims=True)
            p = jnp.exp(scores - mx)
            denom = jnp.sum(p, axis=-1, keepdims=True)
            align = p * pl.reciprocal(denom, approx=approx_recip)      # (Tq, S) f32
            a_list.append(align)

            # context: c = align @ memory_bank
            c = jnp.dot(align.astype(compute_dtype), m,
                        preferred_element_type=jnp.float32)            # (Tq, D) f32
            if fuse_rows:
                c_list.append(c)
            else:
                h = (jnp.dot(c.astype(compute_dtype), wc,
                             preferred_element_type=jnp.float32)
                     + jnp.dot(q, ws, preferred_element_type=jnp.float32))
                h_list.append(jnp.tanh(h))                              # (Tq, D) f32

        a_all = jnp.stack(a_list, axis=0)                               # (Bb, Tq, S) f32

        # output projection: attn_h = tanh(c @ Wc + q @ Ws)   (no bias for 'dot')
        if fuse_rows:
            rows = block_b * block_t
            c_all = jnp.stack(c_list, axis=0)                           # (Bb, Tq, D) f32
            h = (jnp.dot(c_all.reshape(rows, D).astype(compute_dtype), wc,
                         preferred_element_type=jnp.float32)
                 + jnp.dot(q_all.reshape(rows, D), ws,
                           preferred_element_type=jnp.float32))
            h_all = jnp.tanh(h).reshape(block_b, block_t, D)
        else:
            h_all = jnp.stack(h_list, axis=0)                           # (Bb, Tq, D) f32

        # store directly in PyTorch's [tgt, batch, *] layout (full-block dense stores)
        out_ref[...] = pltpu.einshape("btd->tbd", h_all).astype(out_ref.dtype)
        attn_ref[...] = pltpu.einshape("bts->tbs", a_all).astype(attn_ref.dtype)

    return kernel


def global_attention_dot(source, memory_bank, memory_lengths, linear_out_w,
                         *, compute_dtype=None, align_dtype=None,
                         block_t=None, approx_recip=True,
                         vmem_limit_bytes=_VMEM_LIMIT_BYTES):
    """
    Pallas-TPU forward of GlobalAttention(attn_type='dot'), multi-step path.

    source:         [B, T, D]
    memory_bank:    [B, S, D]
    memory_lengths: [B] int
    linear_out_w:   [D, 2*D]  (PyTorch nn.Linear weight layout; no bias for 'dot')

    Returns (attn_h [T, B, D], align_vectors [T, B, S]) in PyTorch's layout, written
    directly by the kernel (no post-kernel transpose pass).

    compute_dtype: dtype fed to the MXU (e.g. jnp.bfloat16 on v5e/v6e/v7x fast path).
    align_dtype:   dtype of the (large) align output; bf16 halves its HBM writeback.
    """
    B, T, D = source.shape
    _, S, _ = memory_bank.shape
    compute_dtype = source.dtype if compute_dtype is None else compute_dtype
    align_dtype = source.dtype if align_dtype is None else align_dtype
    out_dtype = source.dtype

    # torch: out = concat([c, source]) @ W^T  ->  c @ W[:, :D]^T + source @ W[:, D:]^T
    wc = jnp.transpose(linear_out_w[:, :D]).astype(compute_dtype)   # (D, D)
    ws = jnp.transpose(linear_out_w[:, D:]).astype(compute_dtype)   # (D, D)
    lengths = memory_lengths.astype(jnp.int32)

    # Batch tile: whole batch unless it cleanly splits into sublane-aligned groups of 8
    # (keeps every BlockSpec's second-minor dim either full or a multiple of 8).
    block_b = 8 if (B > 8 and B % 8 == 0) else B
    if block_t is None:
        block_t = _pick_block_t(
            T, S, D, block_b,
            np.dtype(source.dtype).itemsize, np.dtype(out_dtype).itemsize,
            np.dtype(align_dtype).itemsize, np.dtype(compute_dtype).itemsize)

    grid = (pl.cdiv(T, block_t), pl.cdiv(B, block_b))
    kernel = _make_kernel(block_b, block_t, S, D, compute_dtype, approx_recip)

    # NOTE: for best store efficiency in production, pad S and D to multiples of 128
    # in the caller (the length mask already neutralizes padded src columns).
    grid_spec = pltpu.PrefetchScalarGridSpec(
        num_scalar_prefetch=1,
        grid=grid,
        in_specs=[
            pl.BlockSpec((block_b, block_t, D), lambda t, bb, ln: (bb, t, 0)),  # source
            pl.BlockSpec((block_b, S, D), lambda t, bb, ln: (bb, 0, 0)),        # memory_bank
            pl.BlockSpec((D, D), lambda t, bb, ln: (0, 0)),                     # Wc
            pl.BlockSpec((D, D), lambda t, bb, ln: (0, 0)),                     # Ws
        ],
        out_specs=[
            pl.BlockSpec((block_t, block_b, D), lambda t, bb, ln: (t, bb, 0)),  # attn_h [T,B,D]
            pl.BlockSpec((block_t, block_b, S), lambda t, bb, ln: (t, bb, 0)),  # align  [T,B,S]
        ],
    )

    attn_h, align = pl.pallas_call(
        kernel,
        out_shape=(
            jax.ShapeDtypeStruct((T, B, D), out_dtype),
            jax.ShapeDtypeStruct((T, B, S), align_dtype),
        ),
        grid_spec=grid_spec,
        compiler_params=pltpu.CompilerParams(
            dimension_semantics=("parallel", "parallel"),
            vmem_limit_bytes=vmem_limit_bytes,
        ),
    )(lengths, source, memory_bank, wc, ws)

    return attn_h, align


def _reference(source, memory_bank, memory_lengths, linear_out_w):
    """Pure-JAX reference mirroring the PyTorch forward (attn_type='dot')."""
    B, T, D = source.shape
    _, S, _ = memory_bank.shape
    align = jnp.einsum('btd,bsd->bts', source, memory_bank)
    mask = jnp.arange(S)[None, :] < memory_lengths[:, None]          # [B, S]
    align = jnp.where(mask[:, None, :], align, -jnp.inf)
    av = jax.nn.softmax(align, axis=-1)
    c = jnp.einsum('bts,bsd->btd', av, memory_bank)
    concat = jnp.concatenate([c, source], axis=-1)                   # [B, T, 2D]
    attn_h = jnp.tanh(jnp.einsum('btk,dk->btd', concat, linear_out_w))
    return jnp.transpose(attn_h, (1, 0, 2)), jnp.transpose(av, (1, 0, 2))


if __name__ == "__main__":
    B, T, S, D = 2, 8, 8, 32

    key = jax.random.PRNGKey(0)
    k1, k2, k3 = jax.random.split(key, 3)
    source = jax.random.normal(k1, (B, T, D), dtype=jnp.float32)
    memory_bank = jax.random.normal(k2, (B, S, D), dtype=jnp.float32)
    memory_lengths = jnp.array([S, S - 3], dtype=jnp.int32)

    # deterministic parameter init (PyTorch-style uniform bound); linear_out: [D, 2D], no bias
    bound = 1.0 / (2.0 * D) ** 0.5
    linear_out_w = jax.random.uniform(k3, (D, 2 * D), dtype=jnp.float32,
                                      minval=-bound, maxval=bound)

    ref_h, ref_a = _reference(source, memory_bank, memory_lengths, linear_out_w)

    # 1) f32 path with exact reciprocal: tight correctness check vs the JAX reference.
    attn_h, align = global_attention_dot(source, memory_bank, memory_lengths,
                                         linear_out_w, approx_recip=False)
    jax.block_until_ready(attn_h)
    jax.block_until_ready(align)
    assert attn_h.shape == (T, B, D) and align.shape == (T, B, S)
    assert jnp.allclose(attn_h, ref_h, atol=1e-5, rtol=1e-5)
    assert jnp.allclose(align, ref_a, atol=1e-5, rtol=1e-5)

    # 2) fast path: bf16 MXU operands, bf16 align writeback, approx (EUP) reciprocal.
    #    Loose tolerance is the expected bf16/approx rounding, not a kernel bug.
    attn_h_bf, align_bf = global_attention_dot(
        source, memory_bank, memory_lengths, linear_out_w,
        compute_dtype=jnp.bfloat16, align_dtype=jnp.bfloat16)
    jax.block_until_ready(attn_h_bf)
    jax.block_until_ready(align_bf)
    assert jnp.allclose(attn_h_bf.astype(jnp.float32), ref_h, atol=2e-1, rtol=2e-1)
    assert jnp.allclose(align_bf.astype(jnp.float32), ref_a, atol=2e-1, rtol=2e-1)

    print("KERNEL_OK")
</pallas_src>

<mosaic_0001>
module attributes {stable_mosaic.version = 11 : i64} {
  func.func @kernel(%arg0: i32, %arg1: i32, %arg2: memref<2xi32, #tpu.memory_space<smem>>, %arg3: memref<2x8x32xf32, #tpu.memory_space<vmem>>, %arg4: memref<2x8x32xf32, #tpu.memory_space<vmem>>, %arg5: memref<32x32xf32, #tpu.memory_space<vmem>>, %arg6: memref<32x32xf32, #tpu.memory_space<vmem>>, %arg7: memref<8x2x32xf32, #tpu.memory_space<vmem>>, %arg8: memref<8x2x8xf32, #tpu.memory_space<vmem>>) attributes {dimension_semantics = [#tpu.dimension_semantics<parallel>, #tpu.dimension_semantics<parallel>], iteration_bounds = array<i64: 1, 1>, scalar_prefetch = 1 : i64, scratch_operands = 0 : i64, tpu.core_type = #tpu.core_type<tc>, window_params = [{transform_indices = @transform_0, window_bounds = array<i64: 2, 8, 32>}, {transform_indices = @transform_1, window_bounds = array<i64: 2, 8, 32>}, {pipeline_mode = #tpu.pipeline_mode<synchronous>, transform_indices = @transform_2, window_bounds = array<i64: 32, 32>}, {pipeline_mode = #tpu.pipeline_mode<synchronous>, transform_indices = @transform_3, window_bounds = array<i64: 32, 32>}, {transform_indices = @transform_4, window_bounds = array<i64: 8, 2, 32>}, {transform_indices = @transform_5, window_bounds = array<i64: 8, 2, 8>}]} {
    %c0 = arith.constant 0 : index
    %c0_0 = arith.constant 0 : index
    %c0_1 = arith.constant 0 : index
    %0 = vector.load %arg3[%c0, %c0_0, %c0_1] : memref<2x8x32xf32, #tpu.memory_space<vmem>>, vector<2x8x32xf32>
    %c0_2 = arith.constant 0 : index
    %c0_3 = arith.constant 0 : index
    %1 = vector.load %arg5[%c0_2, %c0_3] : memref<32x32xf32, #tpu.memory_space<vmem>>, vector<32x32xf32>
    %c0_4 = arith.constant 0 : index
    %c0_5 = arith.constant 0 : index
    %2 = vector.load %arg6[%c0_4, %c0_5] : memref<32x32xf32, #tpu.memory_space<vmem>>, vector<32x32xf32>
    %3 = vector.extract_strided_slice %0 {offsets = [0, 0, 0], sizes = [1, 8, 32], strides = [1, 1, 1]} : vector<2x8x32xf32> to vector<1x8x32xf32>
    %4 = vector.shape_cast %3 : vector<1x8x32xf32> to vector<8x32xf32>
    %c0_6 = arith.constant 0 : index
    %c0_7 = arith.constant 0 : index
    %c0_8 = arith.constant 0 : index
    %5 = vector.load %arg4[%c0_6, %c0_7, %c0_8] : memref<2x8x32xf32, #tpu.memory_space<vmem>>, vector<1x8x32xf32>
    %6 = vector.shape_cast %5 : vector<1x8x32xf32> to vector<8x32xf32>
    %cst = arith.constant dense<0.000000e+00> : vector<8x8xf32>
    %7 = tpu.matmul %4, %6, %cst {dimension_numbers = #tpu.dot_dimension_numbers<[1], [1], [0], [0], [0, 0, 1, 0], [], []>} : vector<8x32xf32>, vector<8x32xf32>, vector<8x8xf32> -> vector<8x8xf32>
    %c2_i32 = arith.constant 2 : i32
    %8 = arith.muli %arg1, %c2_i32 : i32
    %c0_i32 = arith.constant 0 : i32
    %9 = arith.addi %8, %c0_i32 : i32
    %10 = arith.index_cast %9 : i32 to index
    %11 = memref.load %arg2[%10] : memref<2xi32, #tpu.memory_space<smem>>
    %12 = tpu.iota {dimensions = array<i32: 1>} : vector<8x8xi32>
    %13 = vector.broadcast %11 : i32 to vector<8x8xi32>
    %14 = arith.cmpi slt, %12, %13 : vector<8x8xi32>
    %cst_9 = arith.constant 0xFF800000 : f32
    %15 = vector.broadcast %cst_9 : f32 to vector<8x8xf32>
    %16 = arith.select %14, %7, %15 : vector<8x8xi1>, vector<8x8xf32>
    %cst_10 = arith.constant dense<0xFF800000> : vector<8xf32>
    %17 = vector.multi_reduction <maximumf>, %16, %cst_10 [1] : vector<8x8xf32> to vector<8xf32>
    %18 = vector.shape_cast %17 : vector<8xf32> to vector<8x1xf32>
    %19 = vector.broadcast %18 : vector<8x1xf32> to vector<8x8xf32>
    %20 = arith.subf %16, %19 : vector<8x8xf32>
    %21 = math.exp %20 : vector<8x8xf32>
    %cst_11 = arith.constant dense<0.000000e+00> : vector<8xf32>
    %22 = vector.multi_reduction <add>, %21, %cst_11 [1] : vector<8x8xf32> to vector<8xf32>
    %23 = vector.shape_cast %22 : vector<8xf32> to vector<8x1xf32>
    %24 = tpu.reciprocal %23 : vector<8x1xf32> -> vector<8x1xf32>
    %25 = vector.broadcast %24 : vector<8x1xf32> to vector<8x8xf32>
    %26 = arith.mulf %21, %25 : vector<8x8xf32>
    %cst_12 = arith.constant dense<0.000000e+00> : vector<8x32xf32>
    %27 = tpu.matmul %26, %6, %cst_12 {dimension_numbers = #tpu.dot_dimension_numbers<[1], [0], [0], [1], [0, 0, 1, 1], [], []>} : vector<8x8xf32>, vector<8x32xf32>, vector<8x32xf32> -> vector<8x32xf32>
    %28 = vector.extract_strided_slice %0 {offsets = [1, 0, 0], sizes = [1, 8, 32], strides = [1, 1, 1]} : vector<2x8x32xf32> to vector<1x8x32xf32>
    %29 = vector.shape_cast %28 : vector<1x8x32xf32> to vector<8x32xf32>
    %c1 = arith.constant 1 : index
    %c0_13 = arith.constant 0 : index
    %c0_14 = arith.constant 0 : index
    %30 = vector.load %arg4[%c1, %c0_13, %c0_14] : memref<2x8x32xf32, #tpu.memory_space<vmem>>, vector<1x8x32xf32>
    %31 = vector.shape_cast %30 : vector<1x8x32xf32> to vector<8x32xf32>
    %cst_15 = arith.constant dense<0.000000e+00> : vector<8x8xf32>
    %32 = tpu.matmul %29, %31, %cst_15 {dimension_numbers = #tpu.dot_dimension_numbers<[1], [1], [0], [0], [0, 0, 1, 0], [], []>} : vector<8x32xf32>, vector<8x32xf32>, vector<8x8xf32> -> vector<8x8xf32>
    %c2_i32_16 = arith.constant 2 : i32
    %33 = arith.muli %arg1, %c2_i32_16 : i32
    %c1_i32 = arith.constant 1 : i32
    %34 = arith.addi %33, %c1_i32 : i32
    %35 = arith.index_cast %34 : i32 to index
    %36 = memref.load %arg2[%35] : memref<2xi32, #tpu.memory_space<smem>>
    %37 = tpu.iota {dimensions = array<i32: 1>} : vector<8x8xi32>
    %38 = vector.broadcast %36 : i32 to vector<8x8xi32>
    %39 = arith.cmpi slt, %37, %38 : vector<8x8xi32>
    %cst_17 = arith.constant 0xFF800000 : f32
    %40 = vector.broadcast %cst_17 : f32 to vector<8x8xf32>
    %41 = arith.select %39, %32, %40 : vector<8x8xi1>, vector<8x8xf32>
    %cst_18 = arith.constant dense<0xFF800000> : vector<8xf32>
    %42 = vector.multi_reduction <maximumf>, %41, %cst_18 [1] : vector<8x8xf32> to vector<8xf32>
    %43 = vector.shape_cast %42 : vector<8xf32> to vector<8x1xf32>
    %44 = vector.broadcast %43 : vector<8x1xf32> to vector<8x8xf32>
    %45 = arith.subf %41, %44 : vector<8x8xf32>
    %46 = math.exp %45 : vector<8x8xf32>
    %cst_19 = arith.constant dense<0.000000e+00> : vector<8xf32>
    %47 = vector.multi_reduction <add>, %46, %cst_19 [1] : vector<8x8xf32> to vector<8xf32>
    %48 = vector.shape_cast %47 : vector<8xf32> to vector<8x1xf32>
    %49 = tpu.reciprocal %48 : vector<8x1xf32> -> vector<8x1xf32>
    %50 = vector.broadcast %49 : vector<8x1xf32> to vector<8x8xf32>
    %51 = arith.mulf %46, %50 : vector<8x8xf32>
    %cst_20 = arith.constant dense<0.000000e+00> : vector<8x32xf32>
    %52 = tpu.matmul %51, %31, %cst_20 {dimension_numbers = #tpu.dot_dimension_numbers<[1], [0], [0], [1], [0, 0, 1, 1], [], []>} : vector<8x8xf32>, vector<8x32xf32>, vector<8x32xf32> -> vector<8x32xf32>
    %53 = vector.shape_cast %26 : vector<8x8xf32> to vector<1x8x8xf32>
    %54 = vector.shape_cast %51 : vector<8x8xf32> to vector<1x8x8xf32>
    %55 = tpu.concatenate %53, %54 in 0 : vector<1x8x8xf32>, vector<1x8x8xf32> -> vector<2x8x8xf32>
    %56 = vector.shape_cast %27 : vector<8x32xf32> to vector<1x8x32xf32>
    %57 = vector.shape_cast %52 : vector<8x32xf32> to vector<1x8x32xf32>
    %58 = tpu.concatenate %56, %57 in 0 : vector<1x8x32xf32>, vector<1x8x32xf32> -> vector<2x8x32xf32>
    %59 = vector.shape_cast %58 : vector<2x8x32xf32> to vector<16x32xf32>
    %cst_21 = arith.constant dense<0.000000e+00> : vector<16x32xf32>
    %60 = tpu.matmul %59, %1, %cst_21 {dimension_numbers = #tpu.dot_dimension_numbers<[1], [0], [0], [1], [0, 0, 1, 1], [], []>} : vector<16x32xf32>, vector<32x32xf32>, vector<16x32xf32> -> vector<16x32xf32>
    %61 = vector.shape_cast %0 : vector<2x8x32xf32> to vector<16x32xf32>
    %cst_22 = arith.constant dense<0.000000e+00> : vector<16x32xf32>
    %62 = tpu.matmul %61, %2, %cst_22 {dimension_numbers = #tpu.dot_dimension_numbers<[1], [0], [0], [1], [0, 0, 1, 1], [], []>} : vector<16x32xf32>, vector<32x32xf32>, vector<16x32xf32> -> vector<16x32xf32>
    %63 = arith.addf %60, %62 : vector<16x32xf32>
    %64 = math.tanh %63 : vector<16x32xf32>
    %65 = vector.shape_cast %64 : vector<16x32xf32> to vector<2x8x32xf32>
    %66 = tpu.transpose %65, [1, 0, 2] : vector<2x8x32xf32> -> vector<8x2x32xf32>
    %c0_23 = arith.constant 0 : index
    %c0_24 = arith.constant 0 : index
    %c0_25 = arith.constant 0 : index
    %67 = vector.load %arg7[%c0_23, %c0_24, %c0_25] : memref<8x2x32xf32, #tpu.memory_space<vmem>>, vector<8x2x32xf32>
    tpu.vector_store %arg7[%c0_23, %c0_24, %c0_25], %66 {strides = array<i32>} : memref<8x2x32xf32, #tpu.memory_space<vmem>>, vector<8x2x32xf32>,
    %68 = tpu.transpose %55, [1, 0, 2] : vector<2x8x8xf32> -> vector<8x2x8xf32>
    %c0_26 = arith.constant 0 : index
    %c0_27 = arith.constant 0 : index
    %c0_28 = arith.constant 0 : index
    %69 = vector.load %arg8[%c0_26, %c0_27, %c0_28] : memref<8x2x8xf32, #tpu.memory_space<vmem>>, vector<8x2x8xf32>
    tpu.vector_store %arg8[%c0_26, %c0_27, %c0_28], %68 {strides = array<i32>} : memref<8x2x8xf32, #tpu.memory_space<vmem>>, vector<8x2x8xf32>,
    return
  }
  func.func @transform_0(%arg0: i32, %arg1: i32, %arg2: memref<2xi32, #tpu.memory_space<smem>>) -> (i32, i32, i32) {
    %c0_i32 = arith.constant 0 : i32
    %c0_i32_0 = arith.constant 0 : i32
    return %arg1, %arg0, %c0_i32 : i32, i32, i32
  }
  func.func @transform_1(%arg0: i32, %arg1: i32, %arg2: memref<2xi32, #tpu.memory_space<smem>>) -> (i32, i32, i32) {
    %c0_i32 = arith.constant 0 : i32
    %c0_i32_0 = arith.constant 0 : i32
    %c0_i32_1 = arith.constant 0 : i32
    return %arg1, %c0_i32, %c0_i32_0 : i32, i32, i32
  }
  func.func @transform_2(%arg0: i32, %arg1: i32, %arg2: memref<2xi32, #tpu.memory_space<smem>>) -> (i32, i32) {
    %c0_i32 = arith.constant 0 : i32
    %c0_i32_0 = arith.constant 0 : i32
    %c0_i32_1 = arith.constant 0 : i32
    return %c0_i32, %c0_i32_0 : i32, i32
  }
  func.func @transform_3(%arg0: i32, %arg1: i32, %arg2: memref<2xi32, #tpu.memory_space<smem>>) -> (i32, i32) {
    %c0_i32 = arith.constant 0 : i32
    %c0_i32_0 = arith.constant 0 : i32
    %c0_i32_1 = arith.constant 0 : i32
    return %c0_i32, %c0_i32_0 : i32, i32
  }
  func.func @transform_4(%arg0: i32, %arg1: i32, %arg2: memref<2xi32, #tpu.memory_space<smem>>) -> (i32, i32, i32) {
    %c0_i32 = arith.constant 0 : i32
    %c0_i32_0 = arith.constant 0 : i32
    return %arg0, %arg1, %c0_i32 : i32, i32, i32
  }
  func.func @transform_5(%arg0: i32, %arg1: i32, %arg2: memref<2xi32, #tpu.memory_space<smem>>) -> (i32, i32, i32) {
    %c0_i32 = arith.constant 0 : i32
    %c0_i32_0 = arith.constant 0 : i32
    return %arg0, %arg1, %c0_i32 : i32, i32, i32
  }
}

</mosaic_0001>

<bundles_post_ra>
// kernel: tpu_custom_call.1
= control target key start
LH: loop header
LB: loop body
LE: loop exit
PB: predicated region body
PF: predicated region fallthrough
CT: control target
= control target key end

     0   :  { %s1293_s0 = inlined_call_operand.hbm [shape: s32[2], index: 0, kind: input, shape index: {}]   ;;  %s1294_s1 = inlined_call_operand.hbm [shape: f32[2,8,32], index: 1, kind: input, shape index: {}]   ;;  %s1295_s2 = inlined_call_operand.hbm [shape: f32[2,8,32], index: 2, kind: input, shape index: {}]   ;;  %s1296_s3 = inlined_call_operand.hbm [shape: f32[32,32], index: 3, kind: input, shape index: {}]   ;;  %s1297_s4 = inlined_call_operand.hbm [shape: f32[32,32], index: 4, kind: input, shape index: {}]   ;;  %s1298_s5 = inlined_call_operand.hbm [shape: f32[8,2,32], index: 5, kind: output, shape index: {0}]   ;;  %s1299_s6 = inlined_call_operand.hbm [shape: f32[8,2,8], index: 6, kind: output, shape index: {1}]  }
   0x1   :  { %s889_s23 = scalar_lea.hbm %s1293_s0, 16 }
   0x2   :  { %p890_p0 = scmp.ne.s32.totalorder %s1293_s0, %s889_s23  ;;  %p893_p1 = scmp.lt.u32.totalorder %s889_s23, %s1293_s0 }
   0x4   :  { %p895_p2 = pnand %p893_p1, %p890_p0 }
   0x6   :  { %898 = shalt.err (!%p895_p2)  }
   0x7   :  { %s1043_s28 = smov [#allocation3]  }
   0x8   :  { %13 = dma.hbm_to_smem %s1293_s0, 16, %s1043_s28, [#allocation2] }
   0x9   :  { %1031 = dma.done.wait [#allocation2], 16 }
   0xa   :  { %1032 = vsyncadd [#allocation2], 4294967280 }
   0xb   :  { %15 = sfence }
   0xc   :  { %16 = vsyncpa [#allocation5], 0 }
   0xd   :  { %17 = vsyncpa [#allocation8], 0 }
   0xe   :  { %18 = vsyncpa [#allocation11], 0 }
   0xf   :  { %19 = vsyncpa [#allocation6], 0 }
  0x10   :  { %20 = vsyncpa [#allocation14], 0  ;;  %s1044_s7 = smov [#allocation7]   ;;  %s1045_s9 = smov [#allocation4]  }
  0x11   :  { %s38_s8 = sshll.u32 %s1044_s7, 4  ;;  %s26_s10 = sshll.u32 %s1045_s9, 4  ;;  %s39_s8 = int_to_ptr.vmem [resolvable:$true] %s38_s8  ;;  %s1105_s10 = int_to_ptr.vmem [resolvable:$true] %s26_s10 }
  0x12   :  { %s899_s13 = scalar_lea.hbm %s1295_s2, 256 }
  0x13   :  { %p900_p3 = scmp.ne.s32.totalorder %s1295_s2, %s899_s13  ;;  %p903_p4 = scmp.lt.u32.totalorder %s899_s13, %s1295_s2 }
  0x15   :  { %p905_p5 = pnand %p903_p4, %p900_p3 }
  0x17   :  { %908 = shalt.err (!%p905_p5)
}
  0x18   :  { %s909_s17 = scalar_lea.vmem %s39_s8, 256  ;;  %p914_p7 = scmp.lt.s32.totalorder %s39_s8, %s39_s8 }
  0x19   :  { %p910_p6 = scmp.ne.s32.totalorder %s39_s8, %s909_s17  ;;  %p915_p8 = scmp.lt.s32.totalorder %s909_s17, %s909_s17 }
  0x1b   :  { %p916_p9 = por %p915_p8, %p914_p7 }
  0x1d   :  { %p917_p10 = pnand %p916_p9, %p910_p6 }
  0x1f   :  { %920 = shalt.err (!%p917_p10)
}
  0x20   :  { %s1046_s18 = smov 128   ;;  %s1047_s19 = smov 8  }
  0x21   :  { %44 = dma.hbm_to_vmem [thread:$0]  %s1295_s2, 256, %s39_s8, [#allocation8], %s1046_s18, %s1046_s18, %s1047_s19  }
  0x22   :  { %s921_s24 = scalar_lea.hbm %s1294_s1, 256 }
  0x23   :  { %p922_p11 = scmp.ne.s32.totalorder %s1294_s1, %s921_s24  ;;  %p925_p12 = scmp.lt.u32.totalorder %s921_s24, %s1294_s1 }
  0x25   :  { %p927_p13 = pnand %p925_p12, %p922_p11 }
  0x27   :  { %930 = shalt.err (!%p927_p13)
}
  0x28   :  { %s931_s29 = scalar_lea.vmem %s1105_s10, 256  ;;  %p936_p1 = scmp.lt.s32.totalorder %s1105_s10, %s1105_s10 }
  0x29   :  { %p932_p0 = scmp.ne.s32.totalorder %s1105_s10, %s931_s29  ;;  %p937_p2 = scmp.lt.s32.totalorder %s931_s29, %s931_s29 }
  0x2b   :  { %p938_p3 = por %p937_p2, %p936_p1 }
  0x2d   :  { %p939_p4 = pnand %p938_p3, %p932_p0 }
  0x2f   :  { %942 = shalt.err (!%p939_p4)
}
  0x30   :  { %32 = dma.hbm_to_vmem [thread:$0]  %s1294_s1, 256, %s1105_s10, [#allocation5], %s1046_s18, %s1046_s18, %s1047_s19  }
  0x31   :  { %s1048_s7 = smov [#allocation9]   ;;  %s1049_s9 = smov [#allocation10]  }
  0x32   :  { %s50_s8 = sshll.u32 %s1048_s7, 4  ;;  %s62_s11 = sshll.u32 %s1049_s9, 4  ;;  %s51_s8 = int_to_ptr.vmem [resolvable:$true] %s50_s8  ;;  %s1142_s11 = int_to_ptr.vmem [resolvable:$true] %s62_s11 }
  0x33   :  { %s943_s0 = scalar_lea.hbm %s1296_s3, 512 }
  0x34   :  { %p944_p5 = scmp.ne.s32.totalorder %s1296_s3, %s943_s0  ;;  %p947_p6 = scmp.lt.u32.totalorder %s943_s0, %s1296_s3 }
  0x36   :  { %p949_p7 = pnand %p947_p6, %p944_p5 }
  0x38   :  { %952 = shalt.err (!%p949_p7)
}
  0x39   :  { %s953_s1 = scalar_lea.vmem %s51_s8, 512  ;;  %p958_p9 = scmp.lt.s32.totalorder %s51_s8, %s51_s8 }
  0x3a   :  { %p954_p8 = scmp.ne.s32.totalorder %s51_s8, %s953_s1  ;;  %p959_p10 = scmp.lt.s32.totalorder %s953_s1, %s953_s1 }
  0x3c   :  { %p960_p11 = por %p959_p10, %p958_p9 }
  0x3e   :  { %p961_p12 = pnand %p960_p11, %p954_p8 }
  0x40   :  { %964 = shalt.err (!%p961_p12)
}
  0x41   :  { %56 = dma.hbm_to_vmem [thread:$0]  %s1296_s3, 512, %s51_s8, [#allocation8], %s1046_s18, %s1046_s18, %s1047_s19  }
  0x42   :  { %s965_s23 = scalar_lea.hbm %s1297_s4, 512 }
  0x43   :  { %p966_p13 = scmp.ne.s32.totalorder %s1297_s4, %s965_s23  ;;  %p969_p0 = scmp.lt.u32.totalorder %s965_s23, %s1297_s4 }
  0x45   :  { %p971_p1 = pnand %p969_p0, %p966_p13 }
  0x47   :  { %974 = shalt.err (!%p971_p1)
}
  0x48   :  { %s975_s28 = scalar_lea.vmem %s1142_s11, 512  ;;  %p980_p3 = scmp.lt.s32.totalorder %s1142_s11, %s1142_s11 }
  0x49   :  { %p976_p2 = scmp.ne.s32.totalorder %s1142_s11, %s975_s28  ;;  %p981_p4 = scmp.lt.s32.totalorder %s975_s28, %s975_s28 }
  0x4b   :  { %p982_p5 = por %p981_p4, %p980_p3 }
  0x4d   :  { %p983_p6 = pnand %p982_p5, %p976_p2 }
  0x4f   :  { %986 = shalt.err (!%p983_p6)
}
  0x50   :  { %68 = dma.hbm_to_vmem [thread:$0]  %s1297_s4, 512, %s1142_s11, [#allocation11], %s1046_s18, %s1046_s18, %s1047_s19  }
  0x51   :  { %1033 = dma.done.wait [#allocation5], 256  }
  0x52   :  { %1034 = vsyncadd [#allocation5], 4294967040 }
  0x53   :  { %1035 = dma.done.wait [#allocation8], 768  }
  0x54   :  { %1036 = vsyncadd [#allocation8], 4294966528 }
  0x55   :  { %1037 = dma.done.wait [#allocation11], 512  }
  0x56   :  { %1038 = vsyncadd [#allocation11], 4294966784  ;;  %v1050_v0 = vmov 0.0   ;;  %vm1051_vm0 = vmmov 0   ;;  %vm92_vm1 = vcmask 261120   ;;  %v91_v1 = vld [vmem:[#allocation7] sm:$0xff]  ;;  %v171_v3 = vlaneseq }
  0x57   :  { %802 = vmatprep.subr.mxu0 %v1050_v0  ;;  %804 = vmatprep.mubr.msk.f32.mxu0 %vm1051_vm0, %v1050_v0  ;;  %v1186_v2 = vld [vmem:[#allocation4] sm:$0xff]  ;;  %s170_s4 = sld [smem:[#allocation3]]  ;;  %vm176_vm3 = vcmask 64512   ;;  %v262_v15 = vld [vmem:[#allocation7 + $0x8] sm:$0xff]  ;;  %v1201_v19 = vld [vmem:[#allocation4 + $0x8] sm:$0xff]  ;;  %s776_s18 = sld [smem:[#allocation3 + $0x1]] }
  0x58   :  { %807 = vmatprep.subr.mxu1 %v1050_v0  ;;  %809 = vmatprep.mubr.msk.f32.mxu1 %vm1051_vm0, %v1050_v0  ;;  %v172_v4 = vand.u32 127, %v171_v3  ;;  %v87_v32 = vld [vmem:[#allocation10] sm:$0xff]  ;;  %v88_v33 = vld [vmem:[#allocation10 + $0x8] sm:$0xff]  ;;  %v85_v38 = vld [vmem:[#allocation9 + $0x10] sm:$0xff]  ;;  %v1052_v42 = vmov 1983009808  }
  0x59   :  { %803 = vmatpush3.xpose.msk.msra.mxu0 %vm92_vm1, %v91_v1  ;;  %808 = vmatpush3.msra.mxu1 %v91_v1  ;;  %v83_v34 = vld [vmem:[#allocation9] sm:$0xff]  ;;  %v844_v35 = vpack.c.bf16 %v88_v33, %v87_v32  ;;  %v84_v36 = vld [vmem:[#allocation9 + $0x8] sm:$0xff]  ;;  %v86_v39 = vld [vmem:[#allocation9 + $0x18] sm:$0xff]  ;;  %v588_v43 = vunpack.c.l.s4 %v1052_v42  ;;  %v591_v45 = vshrl.u32 %v171_v3, 7  ;;  %v1053_v46 = vmov 1934713408  }
  0x5a   :  { %812 = vmatprep.subr.mxu1 %v1050_v0  ;;  %817 = vmatprep.subr.mxu0 %v1050_v0  ;;  %v852_v37 = vpack.c.bf16 %v84_v36, %v83_v34  ;;  %v856_v40 = vpack.c.bf16 %v86_v39, %v85_v38  ;;  %v619_v47 = vunpack.c.l.s4 %v1053_v46  ;;  %v89_v48 = vld [vmem:[#allocation10 + $0x10] sm:$0xff]  ;;  %v90_v49 = vld [vmem:[#allocation10 + $0x18] sm:$0xff]  ;;  %vm727_vm5 = vcmask 58368   ;;  %s1054_s19 = smov [#allocation13]  }
  0x5b   :  { %v589_v44 = vunpack.c.0.s8 %v588_v43  ;;  %v848_v55 = vpack.c.bf16 %v90_v49, %v89_v48  ;;  %s753_s2 = sshll.u32 %s1054_s19, 4  ;;  %s754_s2 = int_to_ptr.vmem [resolvable:$true] %s753_s2 }
  0x5c   :  { %805 = vmatmul.mubr.msk.f32.vlgmr.msra.gmra.mrb[0].mxu0 %vm92_vm1, %v1186_v2  ;;  %v620_v51 = vunpack.c.0.s8 %v619_v47  ;;  %s987_s30 = scalar_lea.vmem %s754_s2, 256  ;;  %p992_p8 = scmp.lt.s32.totalorder %s754_s2, %s754_s2 }
  0x5d   :  { %819 = vmatprep.mubr.msk.f32.mxu0 %vm1051_vm0, %v1050_v0  ;;  %v173_v5 = vstv %s170_s4  ;;  %818 = vmatpush3.msra.mxu0 %v262_v15  ;;  %v341_v20 = vstv %s776_s18  ;;  %v1209_v50 = vsub.s32 %v589_v44, %v591_v45  ;;  %p988_p7 = scmp.ne.s32.totalorder %s754_s2, %s987_s30  ;;  %p993_p9 = scmp.lt.s32.totalorder %s987_s30, %s987_s30 }
  0x5e   :  { %vm174_vm2 = vcmp.lt.s32.totalorder %v172_v4, %v173_v5  ;;  %vm342_vm4 = vcmp.lt.s32.totalorder %v172_v4, %v341_v20  ;;  %845 = vmatprep.subr.bf16.mxu0 %v844_v35  ;;  %v1212_v56 = vsub.s32 %v620_v51, %v591_v45 }
  0x5f   :  { %p994_p10 = por %p993_p9, %p992_p8 }
  0x61   :  { %p995_p11 = pnand %p994_p10, %p988_p7 }
 0x12f   :  { %v165_v6 = vpop.f32.mrb[0].mxu0 }
 0x130   :  { %v175_v7 = vsel %vm174_vm2, %v165_v6, -inf  ;;  %v806_v8 = vpop.f32.mrb[1].mxu0 }
 0x131   :  { %v177_v9 = vsel %vm176_vm3, %v175_v7, -inf }
 0x132   :  { %178 = vmax.xlane.f32.xlu0 %v177_v9 }
 0x1bf   :  { %v179_v10 = vpop.xlane.xlu0 %178 }
 0x1c0   :  { %v180_v11 = vsub.f32 %v175_v7, %v179_v10 }
 0x1c2   :  { %v181_v12 = vmul.f32 1.442695, %v180_v11 }
 0x1c4   :  { %877 = vpow2.f32 %v181_v12 }
 0x1ce   :  { %v878_v13 = vpop.eup %877 }
 0x1cf   :  { %v183_v14 = vsel %vm176_vm3, %v878_v13, 0.0 }
 0x1d0   :  { %184 = vadd.xlane.f32.xlu0 %v183_v14 }
 0x25d   :  { %v185_v16 = vpop.xlane.xlu0 %184 }
 0x25e   :  { %879 = vrcp.f32 %v185_v16 }
 0x268   :  { %v880_v17 = vpop.eup %879 }
 0x269   :  { %v187_v18 = vmul.f32 %v880_v17, %v878_v13 }
 0x26b   :  { %810 = vmatmul.mubr.msk.f32.vlgmr.msra.gmra.mrb[0].mxu1 %vm176_vm3, %v187_v18  ;;  %v661_v53 = vcombine.high %v187_v18, %v1050_v0  ;;  %v668_v57 = vrot.slane %v187_v18, %v1209_v50 }
 0x26c   :  { %813 = vmatpush3.xpose.msk.msra.mxu1 %vm92_vm1, %v262_v15  ;;  %814 = vmatprep.mubr.msk.f32.mxu1 %vm1051_vm0, %v1050_v0 }
 0x26d   :  { %853 = vmatprep.subr.bf16.mxu1 %v852_v37  ;;  %v675_v60 = vrot.slane %v661_v53, %v1209_v50 }
 0x26f   :  { %815 = vmatmul.mubr.msk.f32.vlgmr.msra.gmra.mrb[2].mxu1 %vm92_vm1, %v1201_v19 }
 0x270   :  { %855 = vmatpush3.bf16.msra.mxu1 %v852_v37 }
 0x271   :  { %857 = vmatprep.subr.bf16.mxu1 %v856_v40 }
 0x274   :  { %859 = vmatpush3.bf16.msra.mxu1 %v856_v40 }
 0x33e   :  { %v257_v21 = vpop.f32.mrb[0].mxu1 }
 0x33f   :  { %v811_v22 = vpop.f32.mrb[1].mxu1  ;;  %841 = vmatprep.mubr.msk.f32.mxu1 %vm92_vm1, %v257_v21 }
 0x342   :  { %v335_v23 = vpop.f32.mrb[2].mxu1 }
 0x343   :  { %v343_v24 = vsel %vm342_vm4, %v335_v23, -inf  ;;  %v816_v25 = vpop.f32.mrb[3].mxu1 }
 0x344   :  { %v344_v26 = vsel %vm176_vm3, %v343_v24, -inf }
 0x345   :  { %345 = vmax.xlane.f32.xlu1 %v344_v26 }
 0x3d2   :  { %v346_v27 = vpop.xlane.xlu1 %345 }
 0x3d3   :  { %v347_v28 = vsub.f32 %v343_v24, %v346_v27 }
 0x3d5   :  { %v348_v29 = vmul.f32 1.442695, %v347_v28 }
 0x3d7   :  { %881 = vpow2.f32 %v348_v29 }
 0x3e1   :  { %v882_v30 = vpop.eup %881 }
 0x3e2   :  { %v350_v31 = vsel %vm176_vm3, %v882_v30, 0.0 }
 0x3e3   :  { %351 = vadd.xlane.f32.xlu1 %v350_v31 }
 0x470   :  { %v352_v41 = vpop.xlane.xlu1 %351 }
 0x471   :  { %883 = vrcp.f32 %v352_v41 }
 0x47b   :  { %v884_v52 = vpop.eup %883 }
 0x47c   :  { %v354_v54 = vmul.f32 %v884_v52, %v882_v30 }
 0x47e   :  { %v676_v58 = vcombine.high %v354_v54, %v1050_v0  ;;  %v683_v59 = vrot.slane %v354_v54, %v1209_v50  ;;  %820 = vmatmul.mubr.msk.f32.vlgmr.msra.gmra.mrb[2].mxu0 %vm176_vm3, %v354_v54 }
 0x47f   :  { %847 = vmatpush3.bf16.msra.mxu0 %v844_v35  ;;  %830 = vmatprep.mubr.msk.f32.mxu0 %vm92_vm1, %v1186_v2 }
 0x480   :  { %v690_v61 = vrot.slane %v676_v58, %v1209_v50  ;;  %v691_v62 = vcombine.low %v668_v57, %v683_v59  ;;  %v692_v63 = vcombine.high %v668_v57, %v683_v59  ;;  %849 = vmatprep.subr.bf16.mxu0 %v848_v55 }
 0x482   :  { %v699_v1 = vrot.slane %v691_v62, %v1212_v56  ;;  %v706_v3 = vrot.slane %v692_v63, %v1212_v56  ;;  %v707_v4 = vcombine.low %v675_v60, %v690_v61  ;;  %v708_v5 = vcombine.high %v675_v60, %v690_v61 }
 0x483   :  { %851 = vmatpush3.bf16.msra.mxu0 %v848_v55 }
 0x484   :  { %v715_v6 = vrot.slane %v707_v4, %v1212_v56  ;;  %v722_v7 = vrot.slane %v708_v5, %v1212_v56  ;;  %v723_v2 = vcombine.high %v699_v1, %v1050_v0  ;;  %v724_v8 = vcombine.high %v706_v3, %v1050_v0  ;;  %728 = vst.msk [vmem:[#allocation13] sm:$0x3] %vm727_vm5, %v699_v1 }
 0x485   :  { %730 = vst.msk [vmem:[#allocation13 + $0x4] sm:$0x3] %vm727_vm5, %v706_v3 }
 0x486   :  { %v725_v9 = vcombine.high %v715_v6, %v1050_v0  ;;  %v726_v10 = vcombine.high %v722_v7, %v1050_v0  ;;  %729 = vst.msk [vmem:[#allocation13 + $0x2] sm:$0x3] %vm727_vm5, %v723_v2  ;;  %731 = vst.msk [vmem:[#allocation13 + $0x6] sm:$0x3] %vm727_vm5, %v724_v8  ;;  %831 = vmatmul.mubr.msk.f32.vlgmr.msra.gmra.mrb[4].mxu0 %vm92_vm1, %v1201_v19 }
 0x487   :  { %732 = vst.msk [vmem:[#allocation13 + $0x8] sm:$0x3] %vm727_vm5, %v715_v6  ;;  %734 = vst.msk [vmem:[#allocation13 + $0xc] sm:$0x3] %vm727_vm5, %v722_v7 }
 0x488   :  { %733 = vst.msk [vmem:[#allocation13 + $0xa] sm:$0x3] %vm727_vm5, %v725_v9  ;;  %735 = vst.msk [vmem:[#allocation13 + $0xe] sm:$0x3] %vm727_vm5, %v726_v10 }
 0x551   :  { %v424_v11 = vpop.f32.mrb[2].mxu0 }
 0x552   :  { %v821_v12 = vpop.f32.mrb[3].mxu0  ;;  %842 = vmatmul.mubr.msk.f32.vlgmr.msra.gmra.mrb[4].mxu1 %vm92_vm1, %v424_v11 }
 0x559   :  { %v832_v13 = vpop.f32.mrb[4].mxu0 }
 0x55a   :  { %v494_v14 = vpop.f32.mrb[5].mxu0 }
 0x55b   :  { %998 = shalt.err (!%p995_p11)
}
 0x55c   :  { %s999_s9 = scalar_lea.hbm %s1299_s6, 256 }
 0x55d   :  { %p1000_p12 = scmp.ne.s32.totalorder %s1299_s6, %s999_s9  ;;  %p1003_p13 = scmp.lt.u32.totalorder %s999_s9, %s1299_s6 }
 0x55f   :  { %p1005_p0 = pnand %p1003_p13, %p1000_p12 }
 0x561   :  { %1008 = shalt.err (!%p1005_p0)
}
 0x562   :  { %s1055_s14 = smov 32   ;;  %s1056_s15 = smov 2   ;;  %vm652_vm6 = vcmask 254976  }
 0x563   :  { %759 = dma.vmem_to_hbm [thread:$0]  %s754_s2, 256, %s1299_s6, [#allocation14], %s1055_s14, %s1055_s14, %s1056_s15  }
 0x564   :  { %s1057_s6 = smov [#allocation12]  }
 0x565   :  { %s741_s1 = sshll.u32 %s1057_s6, 4  ;;  %s742_s1 = int_to_ptr.vmem [resolvable:$true] %s741_s1 }
 0x566   :  { %s1009_s10 = scalar_lea.vmem %s742_s1, 256  ;;  %p1014_p2 = scmp.lt.s32.totalorder %s742_s1, %s742_s1 }
 0x567   :  { %p1010_p1 = scmp.ne.s32.totalorder %s742_s1, %s1009_s10  ;;  %p1015_p3 = scmp.lt.s32.totalorder %s1009_s10, %s1009_s10 }
 0x569   :  { %p1016_p4 = por %p1015_p3, %p1014_p2 }
 0x56b   :  { %p1017_p5 = pnand %p1016_p4, %p1010_p1 }
 0x625   :  { %v843_v15 = vpop.f32.mrb[4].mxu1 }
 0x626   :  { %v581_v16 = vadd.f32 %v843_v15, %v832_v13  ;;  %v575_v17 = vpop.f32.mrb[5].mxu1 }
 0x627   :  { %v576_v18 = vadd.f32 %v575_v17, %v494_v14 }
 0x628   :  { %885 = vtanh.f32 %v581_v16 }
 0x629   :  { %887 = vtanh.f32 %v576_v18 }
 0x632   :  { %v886_v19 = vpop.eup %885 }
 0x633   :  { %v888_v20 = vpop.eup %887  ;;  %v601_v21 = vcombine.high %v886_v19, %v1050_v0  ;;  %v608_v22 = vrot.slane %v886_v19, %v1209_v50 }
 0x634   :  { %v586_v23 = vcombine.high %v888_v20, %v1050_v0  ;;  %v593_v24 = vrot.slane %v888_v20, %v1209_v50 }
 0x635   :  { %v615_v25 = vrot.slane %v601_v21, %v1209_v50 }
 0x636   :  { %v600_v26 = vrot.slane %v586_v23, %v1209_v50  ;;  %v616_v27 = vcombine.low %v593_v24, %v608_v22  ;;  %v617_v28 = vcombine.high %v593_v24, %v608_v22 }
 0x638   :  { %v624_v29 = vrot.slane %v616_v27, %v1212_v56  ;;  %v631_v30 = vrot.slane %v617_v28, %v1212_v56  ;;  %v632_v31 = vcombine.low %v600_v26, %v615_v25  ;;  %v633_v32 = vcombine.high %v600_v26, %v615_v25 }
 0x63a   :  { %v640_v33 = vrot.slane %v632_v31, %v1212_v56  ;;  %v647_v34 = vrot.slane %v633_v32, %v1212_v56  ;;  %v648_v35 = vcombine.high %v624_v29, %v1050_v0  ;;  %v649_v36 = vcombine.high %v631_v30, %v1050_v0  ;;  %653 = vst.msk [vmem:[#allocation12] sm:$0x3] %vm652_vm6, %v624_v29 }
 0x63b   :  { %655 = vst.msk [vmem:[#allocation12 + $0x4] sm:$0x3] %vm652_vm6, %v631_v30 }
 0x63c   :  { %v650_v37 = vcombine.high %v640_v33, %v1050_v0  ;;  %v651_v38 = vcombine.high %v647_v34, %v1050_v0  ;;  %654 = vst.msk [vmem:[#allocation12 + $0x2] sm:$0x3] %vm652_vm6, %v648_v35  ;;  %656 = vst.msk [vmem:[#allocation12 + $0x6] sm:$0x3] %vm652_vm6, %v649_v36 }
 0x63d   :  { %657 = vst.msk [vmem:[#allocation12 + $0x8] sm:$0x3] %vm652_vm6, %v640_v33  ;;  %659 = vst.msk [vmem:[#allocation12 + $0xc] sm:$0x3] %vm652_vm6, %v647_v34 }
 0x63e   :  { %658 = vst.msk [vmem:[#allocation12 + $0xa] sm:$0x3] %vm652_vm6, %v650_v37  ;;  %660 = vst.msk [vmem:[#allocation12 + $0xe] sm:$0x3] %vm652_vm6, %v651_v38 }
 0x63f   :  { %1020 = shalt.err (!%p1017_p5)
}
 0x640   :  { %s1021_s22 = scalar_lea.hbm %s1298_s5, 256 }
 0x641   :  { %p1022_p6 = scmp.ne.s32.totalorder %s1298_s5, %s1021_s22  ;;  %p1025_p7 = scmp.lt.u32.totalorder %s1021_s22, %s1298_s5 }
 0x643   :  { %p1027_p8 = pnand %p1025_p7, %p1022_p6 }
 0x645   :  { %1030 = shalt.err (!%p1027_p8)
}
 0x646   :  { %747 = dma.vmem_to_hbm [thread:$0]  %s742_s1, 256, %s1298_s5, [#allocation6], %s1055_s14, %s1055_s14, %s1056_s15  }
 0x647   :  { %1039 = dma.done.wait [#allocation6], 256  }
 0x648   :  { %1040 = vsyncadd [#allocation6], 4294967040 }
 0x649   :  { %1041 = dma.done.wait [#allocation14], 256  }
 0x64a   :  { %1042 = vsyncadd [#allocation14], 4294967040 }
 0x64b   :  { %766 = vsyncpa [#allocation5], 1 }
 0x64c   :  { %767 = vsyncpa [#allocation8], 1 }
 0x64d   :  { %768 = vsyncpa [#allocation11], 1 }
 0x64e   :  { %769 = vsyncpa [#allocation6], 1 }
 0x64f   :  { %770 = vsyncpa [#allocation14], 1 }

</bundles_post_ra>
